<compile_context>
chip_gen: v5e
topology: v5e:2x2
jax: 0.10.0
libtpu: 0.0.40
codegen_flags: <defaults>
</compile_context>

<pallas_src>
import jax
import jax.numpy as jnp
from jax.experimental import pallas as pl
from jax.experimental.pallas import tpu as pltpu

_LANE = 128
_SUBLANE = 8


def _round_up(a, b):
    return pl.cdiv(a, b) * b


def _transform_kernel(x_ref, w1_ref, b1_ref, w2_ref, b2_ref, o_ref):
    # x_ref : [tm, F]  f32   (cast to bf16 in-register)
    # w1_ref: [F, Hp]  bf16  (pre-transposed (in, out), hidden zero-padded to Hp)
    # b1_ref: [1, Hp]  f32
    # w2_ref: [Hp, F]  bf16  (pre-transposed (in, out))
    # b2_ref: [1, F]   f32
    # o_ref : [tm, F]  f32
    x = x_ref[...].astype(jnp.bfloat16)

    # Layer 1: plain [M,K]@[K,N] on the MXU, f32 accumulation.
    h = jnp.dot(x, w1_ref[...], preferred_element_type=jnp.float32)
    h = jnp.maximum(h + b1_ref[...], 0.0)

    # Layer 2 (bf16 operands, f32 accumulate). Padded hidden columns are exactly
    # zero after relu(0 + 0), so they contribute nothing here.
    y = jnp.dot(h.astype(jnp.bfloat16), w2_ref[...],
                preferred_element_type=jnp.float32)
    y = jnp.maximum(y + b2_ref[...], 0.0)
    o_ref[...] = y.astype(o_ref.dtype)


def prepare_params(w1, b1, w2, b2, dim):
    """One-time prep: transpose to (in, out), pad hidden dim to 128 lanes, cast.

    w1, w2: [F, F] in PyTorch (out, in) layout; b1, b2: [F].
    """
    F = dim * dim
    Hp = _round_up(max(F, _LANE), _LANE)
    pad_h = Hp - F
    w1t = jnp.pad(jnp.transpose(w1), ((0, 0), (0, pad_h))).astype(jnp.bfloat16)  # (F, Hp)
    b1p = jnp.pad(b1, (0, pad_h)).reshape(1, Hp).astype(jnp.float32)             # (1, Hp)
    w2t = jnp.pad(jnp.transpose(w2), ((0, pad_h), (0, 0))).astype(jnp.bfloat16)  # (Hp, F)
    b2p = b2.reshape(1, F).astype(jnp.float32)                                   # (1, F)
    return w1t, b1p, w2t, b2p


def transform_module_forward(x, params, dim):
    """x: [B, C, dim, dim]; params = prepare_params(...) output."""
    w1t, b1p, w2t, b2p = params
    B, C = x.shape[0], x.shape[1]
    F = dim * dim
    Hp = w1t.shape[1]
    M = B * C

    # No wrapper-side cast / pad of x: just flatten. Kernel reads f32 directly.
    x2d = x.reshape(M, F)

    # M tiling: large tiles to amortize per-step overhead, multiple of 16 for
    # bf16 sublane packing of the in-register cast; force >= 2 tiles when M is
    # big enough so the "parallel" axis shards across both TCs on v7x.
    cap = 2048
    if M <= 16:
        tm = _round_up(M, _SUBLANE)
    else:
        num_tiles = max(2, pl.cdiv(M, cap))
        tm = max(16, _round_up(pl.cdiv(M, num_tiles), 16))
    grid_m = pl.cdiv(M, tm)  # ragged last tile handled by Pallas masking

    bytes_in = x2d.size * x2d.dtype.itemsize
    bytes_w = w1t.size * 2 + w2t.size * 2 + b1p.size * 4 + b2p.size * 4
    bytes_out = M * F * 4
    cost = pl.CostEstimate(
        flops=2 * M * F * Hp + 2 * M * Hp * F,
        transcendentals=0,
        bytes_accessed=bytes_in + bytes_w + bytes_out,
    )

    out2d = pl.pallas_call(
        _transform_kernel,
        out_shape=jax.ShapeDtypeStruct((M, F), x.dtype),
        grid=(grid_m,),
        in_specs=[
            pl.BlockSpec((tm, F), lambda i: (i, 0)),   # x tile (double-buffered)
            pl.BlockSpec((F, Hp), lambda i: (0, 0)),   # W1^T, VMEM-resident
            pl.BlockSpec((1, Hp), lambda i: (0, 0)),   # b1
            pl.BlockSpec((Hp, F), lambda i: (0, 0)),   # W2^T, VMEM-resident
            pl.BlockSpec((1, F), lambda i: (0, 0)),    # b2
        ],
        out_specs=pl.BlockSpec((tm, F), lambda i: (i, 0)),
        compiler_params=pltpu.CompilerParams(
            dimension_semantics=("parallel",),  # independent M tiles; shards across TCs on v7x
        ),
        cost_estimate=cost,
    )(x2d, w1t, b1p, w2t, b2p)

    return out2d.reshape(B, C, dim, dim)


def init_params(key, dim):
    """Deterministic init mimicking nn.Linear default (uniform in +/- 1/sqrt(fan_in))."""
    F = dim * dim
    k1, k2, k3, k4 = jax.random.split(key, 4)
    bound = 1.0 / jnp.sqrt(jnp.float32(F))
    w1 = jax.random.uniform(k1, (F, F), jnp.float32, -bound, bound)
    b1 = jax.random.uniform(k2, (F,), jnp.float32, -bound, bound)
    w2 = jax.random.uniform(k3, (F, F), jnp.float32, -bound, bound)
    b2 = jax.random.uniform(k4, (F,), jnp.float32, -bound, bound)
    return w1, b1, w2, b2


if __name__ == "__main__":
    dim = 8          # TransformModule default -> F = 64
    B, C = 2, 4      # small batch / channel
    key = jax.random.PRNGKey(0)
    kx, kp = jax.random.split(key)

    x = jax.random.normal(kx, (B, C, dim, dim), jnp.float32)
    w1, b1, w2, b2 = init_params(kp, dim)

    # One-time parameter prep (transpose / pad / bf16 cast), hoisted out of forward.
    params = prepare_params(w1, b1, w2, b2, dim)

    out = transform_module_forward(x, params, dim)
    out = jax.block_until_ready(out)

    # Reference check in plain JAX f32 (same math as the PyTorch forward).
    F_ = dim * dim
    xr = x.reshape(B, C, F_)
    ref = jnp.maximum(xr @ w1.T + b1, 0.0)
    ref = jnp.maximum(ref @ w2.T + b2, 0.0)
    ref = ref.reshape(B, C, dim, dim)

    assert out.shape == (B, C, dim, dim)
    assert out.dtype == x.dtype
    # bf16 MXU operands (f32 accumulate) -> loosened tolerance vs the f32 reference.
    assert jnp.allclose(out, ref, atol=5e-2, rtol=5e-2)

    print("KERNEL_OK")
</pallas_src>

<mosaic_0001>
module attributes {stable_mosaic.version = 11 : i64} {
  func.func @_transform_kernel(%arg0: i32, %arg1: memref<8x64xf32, #tpu.memory_space<vmem>>, %arg2: memref<64x128xbf16, #tpu.memory_space<vmem>>, %arg3: memref<1x128xf32, #tpu.memory_space<vmem>>, %arg4: memref<128x64xbf16, #tpu.memory_space<vmem>>, %arg5: memref<1x64xf32, #tpu.memory_space<vmem>>, %arg6: memref<8x64xf32, #tpu.memory_space<vmem>>) attributes {dimension_semantics = [#tpu.dimension_semantics<parallel>], iteration_bounds = array<i64: 1>, scalar_prefetch = 0 : i64, scratch_operands = 0 : i64, tpu.core_type = #tpu.core_type<tc>, window_params = [{transform_indices = @transform_0, window_bounds = array<i64: 8, 64>}, {pipeline_mode = #tpu.pipeline_mode<synchronous>, transform_indices = @transform_1, window_bounds = array<i64: 64, 128>}, {pipeline_mode = #tpu.pipeline_mode<synchronous>, transform_indices = @transform_2, window_bounds = array<i64: 1, 128>}, {pipeline_mode = #tpu.pipeline_mode<synchronous>, transform_indices = @transform_3, window_bounds = array<i64: 128, 64>}, {pipeline_mode = #tpu.pipeline_mode<synchronous>, transform_indices = @transform_4, window_bounds = array<i64: 1, 64>}, {transform_indices = @transform_5, window_bounds = array<i64: 8, 64>}]} {
    %c0 = arith.constant 0 : index
    %c0_0 = arith.constant 0 : index
    %0 = vector.load %arg1[%c0, %c0_0] : memref<8x64xf32, #tpu.memory_space<vmem>>, vector<8x64xf32>
    %1 = arith.truncf %0 : vector<8x64xf32> to vector<8x64xbf16>
    %c0_1 = arith.constant 0 : index
    %c0_2 = arith.constant 0 : index
    %2 = vector.load %arg2[%c0_1, %c0_2] : memref<64x128xbf16, #tpu.memory_space<vmem>>, vector<64x128xbf16>
    %cst = arith.constant dense<0.000000e+00> : vector<8x128xf32>
    %3 = tpu.matmul %1, %2, %cst {dimension_numbers = #tpu.dot_dimension_numbers<[1], [0], [0], [1], [0, 0, 1, 1], [], []>} : vector<8x64xbf16>, vector<64x128xbf16>, vector<8x128xf32> -> vector<8x128xf32>
    %c0_3 = arith.constant 0 : index
    %c0_4 = arith.constant 0 : index
    %4 = vector.load %arg3[%c0_3, %c0_4] : memref<1x128xf32, #tpu.memory_space<vmem>>, vector<1x128xf32>
    %5 = vector.broadcast %4 : vector<1x128xf32> to vector<8x128xf32>
    %6 = arith.addf %3, %5 : vector<8x128xf32>
    %cst_5 = arith.constant 0.000000e+00 : f32
    %7 = vector.broadcast %cst_5 : f32 to vector<8x128xf32>
    %8 = arith.maximumf %6, %7 : vector<8x128xf32>
    %9 = arith.truncf %8 : vector<8x128xf32> to vector<8x128xbf16>
    %c0_6 = arith.constant 0 : index
    %c0_7 = arith.constant 0 : index
    %10 = vector.load %arg4[%c0_6, %c0_7] : memref<128x64xbf16, #tpu.memory_space<vmem>>, vector<128x64xbf16>
    %cst_8 = arith.constant dense<0.000000e+00> : vector<8x64xf32>
    %11 = tpu.matmul %9, %10, %cst_8 {dimension_numbers = #tpu.dot_dimension_numbers<[1], [0], [0], [1], [0, 0, 1, 1], [], []>} : vector<8x128xbf16>, vector<128x64xbf16>, vector<8x64xf32> -> vector<8x64xf32>
    %c0_9 = arith.constant 0 : index
    %c0_10 = arith.constant 0 : index
    %12 = vector.load %arg5[%c0_9, %c0_10] : memref<1x64xf32, #tpu.memory_space<vmem>>, vector<1x64xf32>
    %13 = vector.broadcast %12 : vector<1x64xf32> to vector<8x64xf32>
    %14 = arith.addf %11, %13 : vector<8x64xf32>
    %cst_11 = arith.constant 0.000000e+00 : f32
    %15 = vector.broadcast %cst_11 : f32 to vector<8x64xf32>
    %16 = arith.maximumf %14, %15 : vector<8x64xf32>
    %c0_12 = arith.constant 0 : index
    %c0_13 = arith.constant 0 : index
    %17 = vector.load %arg6[%c0_12, %c0_13] : memref<8x64xf32, #tpu.memory_space<vmem>>, vector<8x64xf32>
    tpu.vector_store %arg6[%c0_12, %c0_13], %16 {strides = array<i32>} : memref<8x64xf32, #tpu.memory_space<vmem>>, vector<8x64xf32>,
    return
  }
  func.func @transform_0(%arg0: i32) -> (i32, i32) {
    %c0_i32 = arith.constant 0 : i32
    %c0_i32_0 = arith.constant 0 : i32
    return %arg0, %c0_i32 : i32, i32
  }
  func.func @transform_1(%arg0: i32) -> (i32, i32) {
    %c0_i32 = arith.constant 0 : i32
    %c0_i32_0 = arith.constant 0 : i32
    %c0_i32_1 = arith.constant 0 : i32
    return %c0_i32, %c0_i32_0 : i32, i32
  }
  func.func @transform_2(%arg0: i32) -> (i32, i32) {
    %c0_i32 = arith.constant 0 : i32
    %c0_i32_0 = arith.constant 0 : i32
    %c0_i32_1 = arith.constant 0 : i32
    return %c0_i32, %c0_i32_0 : i32, i32
  }
  func.func @transform_3(%arg0: i32) -> (i32, i32) {
    %c0_i32 = arith.constant 0 : i32
    %c0_i32_0 = arith.constant 0 : i32
    %c0_i32_1 = arith.constant 0 : i32
    return %c0_i32, %c0_i32_0 : i32, i32
  }
  func.func @transform_4(%arg0: i32) -> (i32, i32) {
    %c0_i32 = arith.constant 0 : i32
    %c0_i32_0 = arith.constant 0 : i32
    %c0_i32_1 = arith.constant 0 : i32
    return %c0_i32, %c0_i32_0 : i32, i32
  }
  func.func @transform_5(%arg0: i32) -> (i32, i32) {
    %c0_i32 = arith.constant 0 : i32
    %c0_i32_0 = arith.constant 0 : i32
    return %arg0, %c0_i32 : i32, i32
  }
}

</mosaic_0001>

<bundles_post_ra>
// kernel: tpu_custom_call.1
= control target key start
LH: loop header
LB: loop body
LE: loop exit
PB: predicated region body
PF: predicated region fallthrough
CT: control target
= control target key end

     0   :  { %s349_s0 = inlined_call_operand.vmem [shape: f32[8,64], index: 0, kind: input, shape index: {}]   ;;  %s350_s1 = inlined_call_operand.vmem [shape: bf16[64,128], index: 1, kind: input, shape index: {}]   ;;  %s351_s2 = inlined_call_operand.vmem [shape: f32[1,128], index: 2, kind: input, shape index: {}]   ;;  %s352_s3 = inlined_call_operand.vmem [shape: bf16[128,64], index: 3, kind: input, shape index: {}]   ;;  %s353_s4 = inlined_call_operand.vmem [shape: f32[1,64], index: 4, kind: input, shape index: {}]   ;;  %s354_s5 = inlined_call_operand.hbm [shape: f32[8,64], index: 5, kind: output, shape index: {}]  }
   0x1   :  { %v230_v0 = vld [vmem:[%s350_s1 + $0x18] sm:$0xff]  ;;  %v229_v2 = vld [vmem:[%s350_s1 + $0x10] sm:$0xff] }
   0x2   :  { %v238_v1 = vld [vmem:[%s352_s3 + $0x38] sm:$0xff]  ;;  %68 = vmatpush.bf16.msra.mxu0 %v230_v0  ;;  %v237_v3 = vld [vmem:[%s352_s3 + $0x30] sm:$0xff] }
   0x3   :  { %147 = vmatpush.bf16.msra.mxu1 %v238_v1 }
   0x4   :  { %10 = vsyncpa [#allocation3], 0  ;;  %v228_v4 = vld [vmem:[%s350_s1 + $0x8] sm:$0xff]  ;;  %v227_v6 = vld [vmem:[%s350_s1] sm:$0xff]  ;;  %vm60_vm0 = vcmask 523264   ;;  %s268_s21 = smov [#allocation2]  }
   0x5   :  { %v236_v5 = vld [vmem:[%s352_s3 + $0x28] sm:$0xff]  ;;  %v22_v7 = vld [vmem:[%s349_s0] sm:$0xff]  ;;  %v234_v10 = vld [vmem:[%s352_s3 + $0x18] sm:$0xff]  ;;  %s167_s22 = sshll.u32 %s268_s21, 4  ;;  %s169_s24 = sshll.u32 %s354_s5, 4  ;;  %s168_s22 = int_to_ptr.vmem [resolvable:$true] %s167_s22  ;;  %s170_s24 = int_to_ptr.hbm [resolvable:$true] %s169_s24 }
   0x6   :  { %69 = vmatpush.bf16.msra.mxu0 %v229_v2  ;;  %v235_v8 = vld [vmem:[%s352_s3 + $0x20] sm:$0xff]  ;;  %v23_v9 = vpack.c.bf16 %v22_v7, %v22_v7  ;;  %v233_v11 = vld [vmem:[%s352_s3 + $0x10] sm:$0xff]  ;;  %v232_v12 = vld [vmem:[%s352_s3 + $0x8] sm:$0xff] }
   0x7   :  { %148 = vmatpush.bf16.msra.mxu1 %v237_v3  ;;  %v231_v13 = vld [vmem:[%s352_s3] sm:$0xff] }
   0x8   :  { %v240_v14 = vld [vmem:[%s351_s2] ss:$0 sm:$0xff] }
   0x9   :  { %v241_v20 = vld [vmem:[%s353_s4] ss:$0 sm:$0xff] }
   0xa   :  { %70 = vmatpush.bf16.msra.mxu0 %v228_v4 }
   0xb   :  { %149 = vmatpush.bf16.msra.mxu1 %v236_v5 }
   0xe   :  { %71 = vmatpush.bf16.msra.mxu0 %v227_v6 }
   0xf   :  { %150 = vmatpush.bf16.msra.mxu1 %v235_v8 }
  0x11   :  { %194 = vmatmul.msk.bf16.vlgmr.msra.gmra.mxu0 %vm60_vm0, %v23_v9 }
  0x13   :  { %151 = vmatpush.bf16.msra.mxu1 %v234_v10 }
  0x17   :  { %152 = vmatpush.bf16.msra.mxu1 %v233_v11 }
  0x1b   :  { %153 = vmatpush.bf16.msra.mxu1 %v232_v12 }
  0x1f   :  { %154 = vmatpush.bf16.msra.mxu1 %v231_v13 }
  0x8e   :  { %v73_v15 = vpop.f32.mrf.mxu0 }
  0x8f   :  { %v74_v16 = vadd.f32 %v240_v14, %v73_v15 }
  0x91   :  { %v77_v17 = vmax.f32 %v74_v16, 0.0 }
  0x93   :  { %v78_v18 = vpack.c.bf16 %v77_v17, %v77_v17 }
  0x95   :  { %155 = vmatmul.bf16.vlgmr.msra.gmra.mxu1 %v78_v18 }
  0x96   :  { %v75_v19 = vpop.f32.mrf.mxu0 }
 0x112   :  { %v156_v21 = vpop.f32.mrf.mxu1 }
 0x113   :  { %v157_v22 = vadd.f32 %v241_v20, %v156_v21 }
 0x115   :  { %v160_v23 = vmax.f32 %v157_v22, 0.0 }
 0x117   :  { %161 = vst.msk [vmem:[#allocation2] sm:$0xff] %vm60_vm0, %v160_v23 }
 0x118   :  { %172 = dma.vmem_to_hbm [thread:$0]  %s168_s22, 128, %s170_s24, [#allocation3]  }
 0x11a   :  { %v158_v24 = vpop.f32.mrf.mxu1 }
 0x11b   :  { %266 = dma.done.wait [#allocation3], 128  }
 0x11c   :  { %267 = vsyncadd [#allocation3], 4294967168 }
 0x11d   :  { %177 = vsyncpa [#allocation3], 1 }

</bundles_post_ra>
